<compile_context>
chip_gen: v6e
topology: v6e:2x2x1
jax: 0.10.0
libtpu: 0.0.40
codegen_flags: <defaults>
</compile_context>

<pallas_src>
import functools
import math

import jax
import jax.numpy as jnp
from jax.experimental import pallas as pl
from jax.experimental.pallas import tpu as pltpu

_LN2 = math.log(2.0)
_LANE_CANDIDATES = (512, 256, 128)   # lane-dense packed view widths
_MAX_TILE_ROWS = 1024                # 1024 x 512 f32 = 2 MiB per input tile
_VMEM_LIMIT_BYTES = 32 * 1024 * 1024


def _laplace_nll_kernel(x_ref, t_ref, s_ref, o_ref, acc_ref, *,
                        eps, tile_rows, acc_rows, lane, inner_tiles):
    """Streams (tile_rows, lane) tiles, accumulates sum(log(s) + |x-t|/s).

    The inner grid axis (1) is the reduction axis.  Each step folds its loss
    tile down to an (acc_rows, lane) slab with pure VALU vreg adds and adds it
    to a small VMEM accumulator; only the final inner step does the single
    cross-lane reduce and writes the (1,1) SMEM partial for this outer chunk.
    """
    k = pl.program_id(1)

    @pl.when(k == 0)
    def _init():
        acc_ref[...] = jnp.zeros_like(acc_ref)

    # Upcast inside the kernel (no wrapper-side astype / extra HBM pass).
    x = x_ref[...].astype(jnp.float32)
    t = t_ref[...].astype(jnp.float32)
    s = jnp.maximum(s_ref[...].astype(jnp.float32), eps)   # scale.clamp_(min=eps)

    # log(2*s) == log(s) + ln(2); the ln(2)*count constant is added once in the
    # wrapper epilogue.  Exact division (not approx reciprocal) for accuracy.
    loss = jnp.log(s) + jnp.abs(x - t) / s

    if tile_rows > acc_rows:
        # Fold the tile to a small slab: reduce over the leading (non-layout)
        # axis => a chain of vreg adds on the VPU, no extra VMEM round-trips.
        loss = loss.reshape(tile_rows // acc_rows, acc_rows, lane).sum(axis=0)

    acc_ref[...] += loss

    @pl.when(k == inner_tiles - 1)
    def _finalize():
        o_ref[0, 0] = jnp.sum(acc_ref[...])   # one small XLU reduce per chunk


def _choose_tile_rows(rows, max_rows):
    """Largest valid tile height: full height, or a multiple-of-8 divisor."""
    if rows <= max_rows:
        return rows
    d = (max_rows // 8) * 8
    while d >= 8:
        if rows % d == 0:
            return d
        d -= 8
    # Rare fallback: remainder rows are handled by the plain-JAX tail.
    return (max_rows // 8) * 8


def _choose_outer(n_tiles):
    """Divisor of n_tiles; prefer even values so v7x's 2 TCs split evenly."""
    for cand in (8, 6, 4, 2):
        if n_tiles % cand == 0:
            return cand
    for cand in (7, 5, 3):
        if n_tiles % cand == 0:
            return cand
    return 1


def _jax_partial_sum(x, t, s, eps):
    """Exact plain-JAX sum of log(2*s_c) + |x-t|/s_c for small remainders."""
    x = x.astype(jnp.float32)
    t = t.astype(jnp.float32)
    s = jnp.maximum(s.astype(jnp.float32), eps)
    return jnp.sum(jnp.log(2.0 * s) + jnp.abs(x - t) / s)


def laplace_nll(inp, target, scale, eps=1e-06, reduction="mean",
                max_tile_rows=_MAX_TILE_ROWS):
    """Laplace NLL matching Custom_Laplace.forward for reduction in {mean, sum}."""
    if inp.shape != target.shape or inp.shape != scale.shape:
        raise ValueError("input, target and scale must have the same shape")
    if reduction not in ("none", "mean", "sum"):
        raise ValueError(reduction + " is not valid")
    if reduction == "none":
        # TODO(synk): reduction='none' (per-sample loss vector) needs a
        # per-sample layout; not implemented in this kernel.
        raise NotImplementedError("reduction='none' is not supported here")
    # TODO(synk): torch.any(scale < 0) -> ValueError is a data-dependent
    # host-side raise with no clean in-kernel equivalent.

    batch = inp.shape[0]
    n = inp.size

    xf = inp.reshape(-1)
    tf = target.reshape(-1)
    sf = scale.reshape(-1)

    # Lane width: largest of {512, 256, 128} dividing n (free reshape, no pad).
    lane = next((c for c in _LANE_CANDIDATES if n % c == 0), _LANE_CANDIDATES[-1])
    rows = n // lane

    if rows == 0:
        # Tiny input: not worth a kernel launch.
        total = _jax_partial_sum(xf, tf, sf, eps)
        return total / batch if reduction == "mean" else total

    tile_rows = _choose_tile_rows(rows, max_tile_rows)
    n_tiles = rows // tile_rows
    rows_main = n_tiles * tile_rows
    n_kernel = rows_main * lane          # elements covered by the kernel

    g_outer = _choose_outer(n_tiles)     # parallel chunks (v7x megacore)
    g_inner = n_tiles // g_outer         # reduction tiles per chunk
    acc_rows = 8 if (tile_rows % 8 == 0 and tile_rows > 8) else tile_rows

    # Kernel operand: the original contiguous data viewed as (rows, lane).
    n_lane = rows * lane
    if n_lane == n:
        x2 = xf.reshape(rows, lane)
        t2 = tf.reshape(rows, lane)
        s2 = sf.reshape(rows, lane)
    else:
        # Rare path (n not a multiple of 128): prefix slice feeds the kernel,
        # the short remainder is summed in plain JAX below.
        x2 = xf[:n_lane].reshape(rows, lane)
        t2 = tf[:n_lane].reshape(rows, lane)
        s2 = sf[:n_lane].reshape(rows, lane)

    def in_index(i, k):
        return (i * g_inner + k, 0)

    kernel = functools.partial(
        _laplace_nll_kernel,
        eps=float(eps),
        tile_rows=tile_rows,
        acc_rows=acc_rows,
        lane=lane,
        inner_tiles=g_inner,
    )

    in_bytes = (xf.dtype.itemsize + tf.dtype.itemsize + sf.dtype.itemsize)
    cost = pl.CostEstimate(
        flops=5 * n_kernel,
        transcendentals=2 * n_kernel,
        bytes_accessed=n_kernel * in_bytes + g_outer * 4,
    )

    partials = pl.pallas_call(
        kernel,
        out_shape=jax.ShapeDtypeStruct((g_outer, 1), jnp.float32),
        grid_spec=pltpu.PrefetchScalarGridSpec(
            num_scalar_prefetch=0,
            grid=(g_outer, g_inner),
            in_specs=[
                pl.BlockSpec((tile_rows, lane), in_index),
                pl.BlockSpec((tile_rows, lane), in_index),
                pl.BlockSpec((tile_rows, lane), in_index),
            ],
            out_specs=pl.BlockSpec((1, 1), lambda i, k: (i, 0),
                                   memory_space=pltpu.SMEM),
            scratch_shapes=[pltpu.VMEM((acc_rows, lane), jnp.float32)],
        ),
        compiler_params=pltpu.CompilerParams(
            dimension_semantics=("parallel", "arbitrary"),
            vmem_limit_bytes=_VMEM_LIMIT_BYTES,
        ),
        cost_estimate=cost,
    )(x2, t2, s2)

    # Epilogue: per-chunk partials + ln(2) * (#kernel elements)  (the kernel
    # computes log(s) instead of log(2*s)), plus the exact plain-JAX sum of
    # any remainder elements not covered by the kernel tiles.
    total = jnp.sum(partials) + n_kernel * _LN2
    if n_kernel < n:
        total = total + _jax_partial_sum(xf[n_kernel:], tf[n_kernel:],
                                         sf[n_kernel:], eps)

    if reduction == "mean":
        return total / batch
    return total


def laplace_nll_ref(inp, target, scale, eps=1e-06, reduction="mean"):
    """Pure-JAX reference mirroring the PyTorch forward."""
    b = inp.shape[0]
    x = inp.reshape(b, -1).astype(jnp.float32)
    t = target.reshape(b, -1).astype(jnp.float32)
    sc = jnp.maximum(scale.reshape(b, -1).astype(jnp.float32), eps)
    loss = (jnp.log(2.0 * sc) + jnp.abs(x - t) / sc).sum(axis=1)
    return loss.mean() if reduction == "mean" else loss.sum()


if __name__ == "__main__":
    key = jax.random.PRNGKey(0)

    def make(shape, k):
        k1, k2, k3 = jax.random.split(k, 3)
        x = jax.random.normal(k1, shape, dtype=jnp.float32)
        t = jax.random.normal(k2, shape, dtype=jnp.float32)
        # scale must be >= 0 (Laplace std); use |normal| + small offset
        s = jnp.abs(jax.random.normal(k3, shape, dtype=jnp.float32)) + 0.1
        return x, t, s

    keys = jax.random.split(key, 3)

    # Primary small NCHW case: batch=2, channels=4, spatial 16x16.
    x, t, s = make((2, 4, 16, 16), keys[0])
    out = jax.block_until_ready(laplace_nll(x, t, s))
    ref = laplace_nll_ref(x, t, s)
    assert jnp.allclose(out, ref, rtol=1e-4, atol=1e-4), (out, ref)

    # Multi-tile path: small max_tile_rows exercises the fold + 2-D grid
    # (g_outer=8 parallel chunks x g_inner=2 reduction tiles).
    x, t, s = make((2, 16, 64, 64), keys[1])
    out = jax.block_until_ready(laplace_nll(x, t, s, max_tile_rows=16))
    ref = laplace_nll_ref(x, t, s)
    assert jnp.allclose(out, ref, rtol=1e-4, atol=1e-4), (out, ref)

    out = jax.block_until_ready(laplace_nll(x, t, s, reduction="sum"))
    ref = laplace_nll_ref(x, t, s, reduction="sum")
    assert jnp.allclose(out, ref, rtol=1e-4, atol=1e-4), (out, ref)

    # Element count not a multiple of 128 -> plain-JAX tail path.
    x, t, s = make((2, 3, 5, 7), keys[2])
    out = jax.block_until_ready(laplace_nll(x, t, s))
    ref = laplace_nll_ref(x, t, s)
    assert jnp.allclose(out, ref, rtol=1e-4, atol=1e-4), (out, ref)

    print("KERNEL_OK")
</pallas_src>

<mosaic_0001>
module attributes {stable_mosaic.version = 11 : i64} {
  func.func @_laplace_nll_kernel(%arg0: i32, %arg1: i32, %arg2: memref<4x512xf32, #tpu.memory_space<vmem>>, %arg3: memref<4x512xf32, #tpu.memory_space<vmem>>, %arg4: memref<4x512xf32, #tpu.memory_space<vmem>>, %arg5: memref<1x1xf32, #tpu.memory_space<smem>>, %arg6: memref<4x512xf32, #tpu.memory_space<vmem>>) attributes {dimension_semantics = [#tpu.dimension_semantics<parallel>, #tpu.dimension_semantics<arbitrary>], iteration_bounds = array<i64: 1, 1>, scalar_prefetch = 0 : i64, scratch_operands = 1 : i64, tpu.core_type = #tpu.core_type<tc>, window_params = [{transform_indices = @transform_0, window_bounds = array<i64: 4, 512>}, {transform_indices = @transform_1, window_bounds = array<i64: 4, 512>}, {transform_indices = @transform_2, window_bounds = array<i64: 4, 512>}, {transform_indices = @transform_3, window_bounds = array<i64: 1, 1>}]} {
    %c0_i32 = arith.constant 0 : i32
    %0 = arith.cmpi eq, %arg1, %c0_i32 : i32
    %1 = arith.extui %0 : i1 to i32
    %c0_i32_0 = arith.constant 0 : i32
    %2 = arith.cmpi ne, %1, %c0_i32_0 : i32
    scf.if %2 {
      %cst_12 = arith.constant 0.000000e+00 : f32
      %19 = vector.broadcast %cst_12 : f32 to vector<4x512xf32>
      %c0_13 = arith.constant 0 : index
      %c0_14 = arith.constant 0 : index
      %20 = vector.load %arg6[%c0_13, %c0_14] : memref<4x512xf32, #tpu.memory_space<vmem>>, vector<4x512xf32>
      tpu.vector_store %arg6[%c0_13, %c0_14], %19 {strides = array<i32>} : memref<4x512xf32, #tpu.memory_space<vmem>>, vector<4x512xf32>,
    } else {
    }
    %c0 = arith.constant 0 : index
    %c0_1 = arith.constant 0 : index
    %3 = vector.load %arg2[%c0, %c0_1] : memref<4x512xf32, #tpu.memory_space<vmem>>, vector<4x512xf32>
    %c0_2 = arith.constant 0 : index
    %c0_3 = arith.constant 0 : index
    %4 = vector.load %arg3[%c0_2, %c0_3] : memref<4x512xf32, #tpu.memory_space<vmem>>, vector<4x512xf32>
    %c0_4 = arith.constant 0 : index
    %c0_5 = arith.constant 0 : index
    %5 = vector.load %arg4[%c0_4, %c0_5] : memref<4x512xf32, #tpu.memory_space<vmem>>, vector<4x512xf32>
    %cst = arith.constant 9.99999997E-7 : f32
    %6 = vector.broadcast %cst : f32 to vector<4x512xf32>
    %7 = arith.maximumf %5, %6 : vector<4x512xf32>
    %8 = math.log %7 : vector<4x512xf32>
    %9 = arith.subf %3, %4 : vector<4x512xf32>
    %10 = math.absf %9 : vector<4x512xf32>
    %11 = arith.divf %10, %7 : vector<4x512xf32>
    %12 = arith.addf %8, %11 : vector<4x512xf32>
    %c0_6 = arith.constant 0 : index
    %c0_7 = arith.constant 0 : index
    %13 = vector.load %arg6[%c0_6, %c0_7] : memref<4x512xf32, #tpu.memory_space<vmem>>, vector<4x512xf32>
    %14 = arith.addf %13, %12 : vector<4x512xf32>
    %c0_8 = arith.constant 0 : index
    %c0_9 = arith.constant 0 : index
    %15 = vector.load %arg6[%c0_8, %c0_9] : memref<4x512xf32, #tpu.memory_space<vmem>>, vector<4x512xf32>
    tpu.vector_store %arg6[%c0_8, %c0_9], %14 {strides = array<i32>} : memref<4x512xf32, #tpu.memory_space<vmem>>, vector<4x512xf32>,
    %c0_i32_10 = arith.constant 0 : i32
    %16 = arith.cmpi eq, %arg1, %c0_i32_10 : i32
    %17 = arith.extui %16 : i1 to i32
    %c0_i32_11 = arith.constant 0 : i32
    %18 = arith.cmpi ne, %17, %c0_i32_11 : i32
    scf.if %18 {
      %c0_12 = arith.constant 0 : index
      %c0_13 = arith.constant 0 : index
      %19 = vector.load %arg6[%c0_12, %c0_13] : memref<4x512xf32, #tpu.memory_space<vmem>>, vector<4x512xf32>
      %20 = vector.shape_cast %19 : vector<4x512xf32> to vector<1x4x512xf32>
      %cst_14 = arith.constant dense<0.000000e+00> : vector<1xf32>
      %21 = vector.multi_reduction <add>, %20, %cst_14 [1, 2] : vector<1x4x512xf32> to vector<1xf32>
      %22 = vector.shape_cast %21 : vector<1xf32> to vector<1x1x1xf32>
      %23 = vector.extract %22[0, 0, 0] : f32 from vector<1x1x1xf32>
      %c0_15 = arith.constant 0 : index
      %c0_16 = arith.constant 0 : index
      %24 = memref.load %arg5[%c0_15, %c0_16] : memref<1x1xf32, #tpu.memory_space<smem>>
      memref.store %23, %arg5[%c0_15, %c0_16] : memref<1x1xf32, #tpu.memory_space<smem>>
    } else {
    }
    return
  }
  func.func @transform_0(%arg0: i32, %arg1: i32) -> (i32, i32) {
    %c1_i32 = arith.constant 1 : i32
    %0 = arith.muli %arg0, %c1_i32 : i32
    %1 = arith.addi %0, %arg1 : i32
    %c0_i32 = arith.constant 0 : i32
    %c0_i32_0 = arith.constant 0 : i32
    return %1, %c0_i32 : i32, i32
  }
  func.func @transform_1(%arg0: i32, %arg1: i32) -> (i32, i32) {
    %c1_i32 = arith.constant 1 : i32
    %0 = arith.muli %arg0, %c1_i32 : i32
    %1 = arith.addi %0, %arg1 : i32
    %c0_i32 = arith.constant 0 : i32
    %c0_i32_0 = arith.constant 0 : i32
    return %1, %c0_i32 : i32, i32
  }
  func.func @transform_2(%arg0: i32, %arg1: i32) -> (i32, i32) {
    %c1_i32 = arith.constant 1 : i32
    %0 = arith.muli %arg0, %c1_i32 : i32
    %1 = arith.addi %0, %arg1 : i32
    %c0_i32 = arith.constant 0 : i32
    %c0_i32_0 = arith.constant 0 : i32
    return %1, %c0_i32 : i32, i32
  }
  func.func @transform_3(%arg0: i32, %arg1: i32) -> (i32, i32) {
    %c0_i32 = arith.constant 0 : i32
    %c0_i32_0 = arith.constant 0 : i32
    return %arg0, %c0_i32 : i32, i32
  }
}

</mosaic_0001>

<bundles_post_ra>
// kernel: tpu_custom_call.1
= control target key start
LH: loop header
LB: loop body
LE: loop exit
PB: predicated region body
PF: predicated region fallthrough
CT: control target
= control target key end

     0   :  { %8 = vsyncpa [#allocation4], 0  ;;  %s268_s0 = inlined_call_operand.hbm [shape: f32[4,512], index: 0, kind: input, shape index: {}]   ;;  %s269_s1 = inlined_call_operand.hbm [shape: f32[4,512], index: 1, kind: input, shape index: {}]   ;;  %s270_s2 = inlined_call_operand.hbm [shape: f32[4,512], index: 2, kind: input, shape index: {}]   ;;  %s271_s3 = inlined_call_operand.hbm [shape: f32[1,1], index: 3, kind: output, shape index: {}]  }
   0x1   :  { %9 = vsyncpa [#allocation7], 0 }
   0x2   :  { %10 = vsyncpa [#allocation5], 0  ;;  %s232_s12 = smov [#allocation6]   ;;  %s233_s14 = smov [#allocation3]  }
   0x3   :  { %s35_s13 = sshll.u32 %s232_s12, 4  ;;  %s21_s15 = sshll.u32 %s233_s14, 4  ;;  %s36_s13 = int_to_ptr.vmem [resolvable:$true] %s35_s13  ;;  %s22_s15 = int_to_ptr.vmem [resolvable:$true] %s21_s15 }
   0x4   :  { %s166_s16 = scalar_lea.vmem %s36_s13, 256  ;;  %p171_p1 = scmp.lt.s32.totalorder %s36_s13, %s36_s13 }
   0x5   :  { %p167_p0 = scmp.ne.s32.totalorder %s36_s13, %s166_s16  ;;  %p172_p2 = scmp.lt.s32.totalorder %s166_s16, %s166_s16 }
   0x7   :  { %p173_p3 = por %p172_p2, %p171_p1 }
   0x9   :  { %p174_p4 = pnand %p173_p3, %p167_p0 }
   0xb   :  { %177 = shalt.err (!%p174_p4)
}
   0xc   :  { %38 = dma.hbm_to_vmem [thread:$0]  %s269_s1, 256, %s36_s13, [#allocation7]  }
   0xd   :  { %s186_s19 = scalar_lea.vmem %s22_s15, 256  ;;  %p191_p6 = scmp.lt.s32.totalorder %s22_s15, %s22_s15 }
   0xe   :  { %p187_p5 = scmp.ne.s32.totalorder %s22_s15, %s186_s19  ;;  %p192_p7 = scmp.lt.s32.totalorder %s186_s19, %s186_s19 }
  0x10   :  { %p193_p8 = por %p192_p7, %p191_p6 }
  0x12   :  { %p194_p9 = pnand %p193_p8, %p187_p5 }
  0x14   :  { %197 = shalt.err (!%p194_p9)
}
  0x15   :  { %24 = dma.hbm_to_vmem [thread:$0]  %s268_s0, 256, %s22_s15, [#allocation4]  }
  0x16   :  { %s234_s22 = smov [#allocation8]  }
  0x17   :  { %s49_s23 = sshll.u32 %s234_s22, 4  ;;  %s50_s23 = int_to_ptr.vmem [resolvable:$true] %s49_s23 }
  0x18   :  { %s206_s24 = scalar_lea.vmem %s50_s23, 256  ;;  %p211_p11 = scmp.lt.s32.totalorder %s50_s23, %s50_s23 }
  0x19   :  { %p207_p10 = scmp.ne.s32.totalorder %s50_s23, %s206_s24  ;;  %p212_p12 = scmp.lt.s32.totalorder %s206_s24, %s206_s24 }
  0x1b   :  { %p213_p13 = por %p212_p12, %p211_p11 }
  0x1d   :  { %p214_p0 = pnand %p213_p13, %p207_p10 }
  0x1f   :  { %217 = shalt.err (!%p214_p0)
}
  0x20   :  { %52 = dma.hbm_to_vmem [thread:$0]  %s270_s2, 256, %s50_s23, [#allocation7]  }
  0x21   :  { %226 = dma.done.wait [#allocation4], 256  }
  0x22   :  { %227 = vsyncadd [#allocation4], 4294967040 }
  0x23   :  { %228 = dma.done.wait [#allocation7], 512  }
  0x24   :  { %229 = vsyncadd [#allocation7], 4294966784  ;;  %v75_v0 = vld [vmem:[#allocation8] sm:$0xff]  ;;  %v76_v1 = vld [vmem:[#allocation8 + $0x8] sm:$0xff]  ;;  %vm110_vm0 = vcmask 1043456   ;;  %s235_s2 = smov [#allocation9]  }
  0x25   :  { %v77_v2 = vmax.f32 %v75_v0, 1e-06  ;;  %v78_v3 = vmax.f32 %v76_v1, 1e-06  ;;  %v71_v4 = vld [vmem:[#allocation3] sm:$0xff]  ;;  %v73_v5 = vld [vmem:[#allocation6] sm:$0xff] }
  0x26   :  { %v72_v6 = vld [vmem:[#allocation3 + $0x8] sm:$0xff]  ;;  %v74_v7 = vld [vmem:[#allocation6 + $0x8] sm:$0xff]  ;;  %v83_v8 = vsub.f32 %v71_v4, %v73_v5 }
  0x27   :  { %150 = vlog2.f32 %v77_v2  ;;  %v84_v9 = vsub.f32 %v72_v6, %v74_v7 }
  0x28   :  { %152 = vlog2.f32 %v78_v3  ;;  %v85_v10 = vand.u32 2147483647, %v83_v8 }
  0x29   :  { %154 = vrcp.f32 %v77_v2  ;;  %v86_v12 = vand.u32 2147483647, %v84_v9 }
  0x2a   :  { %156 = vrcp.f32 %v78_v3 }
  0x34   :  { %v151_v11 = vpop.eup %150 }
  0x35   :  { %v153_v13 = vpop.eup %152  ;;  %v80_v14 = vmul.f32 0.6931472, %v151_v11 }
  0x36   :  { %v155_v15 = vpop.eup %154  ;;  %v82_v16 = vmul.f32 0.6931472, %v153_v13 }
  0x37   :  { %v157_v17 = vpop.eup %156  ;;  %v88_v18 = vmul.f32 %v155_v15, %v85_v10 }
  0x38   :  { %v90_v19 = vmul.f32 %v157_v17, %v86_v12 }
  0x39   :  { %v91_v20 = vadd.f32 %v88_v18, %v80_v14 }
  0x3a   :  { %v92_v21 = vadd.f32 %v90_v19, %v82_v16 }
  0x3b   :  { %v106_v22 = vcombine.high %v91_v20, %v91_v20  ;;  %v111_v23 = vsel %vm110_vm0, %v91_v20, 0.0 }
  0x3c   :  { %v107_v24 = vcombine.high %v92_v21, %v92_v21  ;;  %v114_v26 = vsel %vm110_vm0, %v92_v21, 0.0 }
  0x3d   :  { %v112_v25 = vsel %vm110_vm0, %v106_v22, 0.0 }
  0x3e   :  { %v113_v27 = vadd.f32 %v112_v25, %v111_v23  ;;  %v116_v28 = vsel %vm110_vm0, %v107_v24, 0.0 }
  0x40   :  { %v115_v29 = vadd.f32 %v114_v26, %v113_v27 }
  0x42   :  { %v117_v30 = vadd.f32 %v116_v28, %v115_v29 }
  0x44   :  { %118 = vadd.xlane.f32.xlu0 %v117_v30 }
  0xcd   :  { %v119_v31 = vpop.xlane.xlu0 %118 }
  0xce   :  { %v120_v32 = vrot.slane %v119_v31, 4 }
  0xd0   :  { %v121_v33 = vadd.f32 %v120_v32, %v119_v31 }
  0xd2   :  { %v122_v34 = vrot.slane %v121_v33, 2 }
  0xd4   :  { %v123_v35 = vadd.f32 %v122_v34, %v121_v33 }
  0xd6   :  { %v124_v36 = vrot.slane %v123_v35, 1 }
  0xd8   :  { %v125_v37 = vadd.f32 %v124_v36, %v123_v35 }
  0xda   :  { %144 = vpush %v125_v37 }
 0x10b   :  { %s145_s0 = spop %144 }
 0x10c   :  { %128 = sst [smem:[#allocation9]] %s145_s0 }
 0x10d   :  { %136 = dma.smem_to_hbm %s235_s2, 16, %s271_s3, [#allocation5]  }
 0x10e   :  { %230 = dma.done.wait [#allocation5], 16  }
 0x10f   :  { %231 = vsyncadd [#allocation5], 4294967280 }
 0x110   :  { %140 = sfence }
 0x111   :  { %141 = vsyncpa [#allocation4], 1 }
 0x112   :  { %142 = vsyncpa [#allocation7], 1 }
 0x113   :  { %143 = vsyncpa [#allocation5], 1 }

</bundles_post_ra>
